<compile_context>
chip_gen: v5e
topology: v5e:2x2
jax: 0.10.0
libtpu: 0.0.40
codegen_flags: <defaults>
</compile_context>

<pallas_src>
import functools

import jax
import jax.numpy as jnp
import numpy as np
from jax.experimental import pallas as pl
from jax.experimental.pallas import tpu as pltpu


def _round_up(x, m):
    return ((x + m - 1) // m) * m


# -----------------------------------------------------------------------------
# Fused kernel body (one grid step = one sample b, one reduction tile t)
# -----------------------------------------------------------------------------
def fused_adafusion_kernel(x_img_ref, clouds_ref,
                           w1_imgT_ref, b1_img_ref,
                           w1_cldT_ref, b1_cld_ref,
                           w_heads_img_ref, w_heads_cld_ref, b_heads_ref,
                           out_ref,
                           img_acc, cld_acc,
                           *, S, N, TS, TN, n_img_tiles, n_cld_tiles,
                           num_t, inv_S, att_lo, att_hi):
    """Refs (per grid step):
      x_img_ref       : (1, C, TS)       image spatial tile, lane-dense on S
      clouds_ref      : (1, P, TN)       point tile, lane-dense on N (P == 3)
      w1_imgT_ref     : (Cmid_i, C)      pre-transposed 1x1-conv weight
      b1_img_ref      : (Cmid_i, 1)      column bias
      w1_cldT_ref     : (Cmid_c, P)      pre-transposed per-point MLP weight
      b1_cld_ref      : (Cmid_c, 1)
      w_heads_img_ref : (Cmid_i, TOTAL)  fused img emb+att head (padded cols 0)
      w_heads_cld_ref : (Cmid_c, TOTAL)  fused cld att+emb head (padded cols 0)
      b_heads_ref     : (1, TOTAL)
      out_ref         : (1, 1, TOTAL)    lane-dense output slab for sample b
      img_acc         : (Cmid_i, 1)      running sum (mean pool) scratch
      cld_acc         : (Cmid_c, 1)      running max pool scratch
    """
    t = pl.program_id(1)

    @pl.when(t == 0)
    def _init():
        img_acc[...] = jnp.zeros_like(img_acc)
        cld_acc[...] = jnp.full(cld_acc.shape, -jnp.inf, dtype=cld_acc.dtype)

    # ------------- image branch: 1x1 conv + ReLU + (partial) mean pool -------
    def _img_tile():
        xb = x_img_ref[0]                       # (C, TS), S on lanes
        w1T = w1_imgT_ref[...]                  # (Cmid_i, C)
        C = xb.shape[0]
        if C <= 8:
            # K=C is too small for the MXU: C broadcast-FMAs on the VPU.
            h = b1_img_ref[...]                 # (Cmid_i, 1), lane-broadcasts
            for c in range(C):
                h = h + w1T[:, c:c + 1] * xb[c:c + 1, :]
        else:
            h = jnp.dot(w1T, xb, preferred_element_type=jnp.float32)
            h = h + b1_img_ref[...]
        h = jnp.maximum(h, 0.0)                 # ReLU, (Cmid_i, TS)
        if S % TS != 0:                         # mask ragged last tile (static)
            col = t * TS + jax.lax.broadcasted_iota(jnp.int32, h.shape, 1)
            h = jnp.where(col < S, h, 0.0)
        img_acc[...] += jnp.sum(h, axis=1, keepdims=True)

    if n_img_tiles == num_t:
        _img_tile()
    else:
        pl.when(t < n_img_tiles)(_img_tile)

    # ------------- cloud branch: per-point MLP + ReLU + (partial) max pool ---
    def _cld_tile():
        pb = clouds_ref[0]                      # (P, TN), N on lanes
        w1T = w1_cldT_ref[...]                  # (Cmid_c, P)
        P = pb.shape[0]
        h = b1_cld_ref[...]                     # (Cmid_c, 1)
        for p in range(P):                      # K=3 -> VPU broadcast-FMAs
            h = h + w1T[:, p:p + 1] * pb[p:p + 1, :]
        h = jnp.maximum(h, 0.0)                 # (Cmid_c, TN)
        if N % TN != 0:                         # mask ragged last tile (static)
            col = t * TN + jax.lax.broadcasted_iota(jnp.int32, h.shape, 1)
            h = jnp.where(col < N, h, -jnp.inf)
        cld_acc[...] = jnp.maximum(cld_acc[...],
                                   jnp.max(h, axis=1, keepdims=True))

    if n_cld_tiles == num_t:
        _cld_tile()
    else:
        pl.when(t < n_cld_tiles)(_cld_tile)

    # ------------- finalize: fused heads + sigmoid on attention lanes --------
    @pl.when(t == num_t - 1)
    def _finalize():
        pooled_img = img_acc[...] * inv_S       # mean pool, (Cmid_i, 1)
        # M=1 projections: broadcast-mul + sublane reduce (VPU/XLU); the MXU
        # would be almost entirely idle for a single-row matmul.
        z = jnp.sum(pooled_img * w_heads_img_ref[...], axis=0, keepdims=True)
        z = z + jnp.sum(cld_acc[...] * w_heads_cld_ref[...], axis=0,
                        keepdims=True)
        z = z + b_heads_ref[...]                # (1, TOTAL)
        lane = jax.lax.broadcasted_iota(jnp.int32, z.shape, 1)
        is_att = jnp.logical_and(lane >= att_lo, lane < att_hi)
        out_ref[0] = jnp.where(is_att, jax.nn.sigmoid(z), z)


# -----------------------------------------------------------------------------
# Wrapper
# -----------------------------------------------------------------------------
class AdaFusionV2Pallas:
    """JAX/Pallas re-implementation of AdaFusionV2.forward (single tiled kernel)."""

    MAX_TILE = 1024   # reduction-tile width (lanes); multiple of 128

    def __init__(self, image_weights, cloud_weights):
        (w1_i, b1_i, wemb_i, bemb_i, watt_i, batt_i) = image_weights
        (w1_c, b1_c, wemb_c, bemb_c, watt_c, batt_c) = cloud_weights

        # First layers pre-transposed to (Cmid, C)/(Cmid, P) with column biases,
        # so the kernel produces lane-dense (Cmid, S)/(Cmid, N) tiles with no
        # in-kernel activation transpose.
        self.w1_imgT = jnp.asarray(w1_i, jnp.float32).T                # (Cmid_i, C)
        self.b1_img = jnp.asarray(b1_i, jnp.float32).reshape(-1, 1)    # (Cmid_i, 1)
        self.w1_cldT = jnp.asarray(w1_c, jnp.float32).T                # (Cmid_c, P)
        self.b1_cld = jnp.asarray(b1_c, jnp.float32).reshape(-1, 1)    # (Cmid_c, 1)

        cmid_i = self.w1_imgT.shape[0]
        cmid_c = self.w1_cldT.shape[0]
        self.cmid_i, self.cmid_c = cmid_i, cmid_c

        self.img_emb = int(wemb_i.shape[1])
        self.img_att = int(watt_i.shape[1])
        self.cld_emb = int(wemb_c.shape[1])
        self.cld_att = int(watt_c.shape[1])

        # Lane-dense output slab: [img_emb | img_att | cld_att | cld_emb | pad].
        # image_att and cloud_att are adjacent -> "embedding" is one slice.
        self.off_img_emb = 0
        self.off_img_att = self.img_emb
        self.off_cld_att = self.off_img_att + self.img_att
        self.off_cld_emb = self.off_cld_att + self.cld_att
        used = self.off_cld_emb + self.cld_emb
        self.total = max(128, _round_up(used, 128))
        self.att_lo = self.off_img_att
        self.att_hi = self.off_cld_emb

        # Per-branch fused head weights (emb + att in one matrix each), padded
        # to the 128-lane slab; unused columns are zero.
        w_h_img = np.zeros((cmid_i, self.total), np.float32)
        w_h_img[:, self.off_img_emb:self.off_img_emb + self.img_emb] = np.asarray(wemb_i)
        w_h_img[:, self.off_img_att:self.off_img_att + self.img_att] = np.asarray(watt_i)
        w_h_cld = np.zeros((cmid_c, self.total), np.float32)
        w_h_cld[:, self.off_cld_att:self.off_cld_att + self.cld_att] = np.asarray(watt_c)
        w_h_cld[:, self.off_cld_emb:self.off_cld_emb + self.cld_emb] = np.asarray(wemb_c)
        b_heads = np.zeros((1, self.total), np.float32)
        b_heads[0, self.off_img_emb:self.off_img_emb + self.img_emb] = np.asarray(bemb_i).reshape(-1)
        b_heads[0, self.off_img_att:self.off_img_att + self.img_att] = np.asarray(batt_i).reshape(-1)
        b_heads[0, self.off_cld_att:self.off_cld_att + self.cld_att] = np.asarray(batt_c).reshape(-1)
        b_heads[0, self.off_cld_emb:self.off_cld_emb + self.cld_emb] = np.asarray(bemb_c).reshape(-1)
        self.w_heads_img = jnp.asarray(w_h_img)
        self.w_heads_cld = jnp.asarray(w_h_cld)
        self.b_heads = jnp.asarray(b_heads)

    def __call__(self, batch):
        y = {}

        images = batch["images"]                  # NCHW
        B, C, H, W = images.shape
        S = H * W
        clouds = batch["clouds"]                  # (B, N, 3)
        assert clouds.shape[0] == B
        N, P = int(clouds.shape[1]), int(clouds.shape[2])

        # Free reshape (channels on sublanes, spatial on lanes).
        x_img = images.reshape(B, C, S)
        # Transpose clouds once so N lands on lanes (dense DMA, ~40x less VMEM
        # than a padded 3-wide last dim).
        clouds_t = jnp.transpose(clouds, (0, 2, 1))            # (B, 3, N)
        # TODO(synk): emit clouds as (B, 3, N) (and images as bf16) upstream in
        # the data pipeline to avoid this wrapper-side relayout entirely.

        # Reduction-tile sizes: full extent if small, else a 128-multiple tile.
        TS = S if S <= self.MAX_TILE else self.MAX_TILE
        TN = N if N <= self.MAX_TILE else self.MAX_TILE
        n_img = int(pl.cdiv(S, TS))
        n_cld = int(pl.cdiv(N, TN))
        num_t = max(n_img, n_cld)

        if n_img == num_t:
            img_idx = lambda b, t: (b, 0, t)
        else:
            img_idx = lambda b, t: (b, 0, jnp.minimum(t, n_img - 1))
        if n_cld == num_t:
            cld_idx = lambda b, t: (b, 0, t)
        else:
            cld_idx = lambda b, t: (b, 0, jnp.minimum(t, n_cld - 1))
        const2 = lambda b, t: (0, 0)

        kernel = functools.partial(
            fused_adafusion_kernel,
            S=S, N=N, TS=TS, TN=TN,
            n_img_tiles=n_img, n_cld_tiles=n_cld, num_t=num_t,
            inv_S=1.0 / float(S), att_lo=self.att_lo, att_hi=self.att_hi)

        cost = pl.CostEstimate(
            flops=2 * B * (C * self.cmid_i * S + P * self.cmid_c * N
                           + (self.cmid_i + self.cmid_c) * self.total),
            transcendentals=B * self.total,
            bytes_accessed=4 * (B * C * S + B * P * N + B * self.total
                                + self.cmid_i * (C + 1 + self.total)
                                + self.cmid_c * (P + 1 + self.total)
                                + self.total))

        slab3 = pl.pallas_call(
            kernel,
            out_shape=jax.ShapeDtypeStruct((B, 1, self.total), jnp.float32),
            grid_spec=pltpu.PrefetchScalarGridSpec(
                num_scalar_prefetch=0,
                grid=(B, num_t),
                in_specs=[
                    pl.BlockSpec((1, C, TS), img_idx),
                    pl.BlockSpec((1, P, TN), cld_idx),
                    pl.BlockSpec((self.cmid_i, C), const2),
                    pl.BlockSpec((self.cmid_i, 1), const2),
                    pl.BlockSpec((self.cmid_c, P), const2),
                    pl.BlockSpec((self.cmid_c, 1), const2),
                    pl.BlockSpec((self.cmid_i, self.total), const2),
                    pl.BlockSpec((self.cmid_c, self.total), const2),
                    pl.BlockSpec((1, self.total), const2),
                ],
                out_specs=pl.BlockSpec((1, 1, self.total),
                                       lambda b, t: (b, 0, 0)),
                scratch_shapes=[
                    pltpu.VMEM((self.cmid_i, 1), jnp.float32),
                    pltpu.VMEM((self.cmid_c, 1), jnp.float32),
                ]),
            compiler_params=pltpu.CompilerParams(
                dimension_semantics=("parallel", "arbitrary"),
                vmem_limit_bytes=32 * 1024 * 1024),
            cost_estimate=cost,
        )(x_img, clouds_t, self.w1_imgT, self.b1_img, self.w1_cldT, self.b1_cld,
          self.w_heads_img, self.w_heads_cld, self.b_heads)

        slab = slab3.reshape(B, self.total)

        image_embedding = slab[:, self.off_img_emb:self.off_img_emb + self.img_emb]
        image_atten = slab[:, self.off_img_att:self.off_img_att + self.img_att]
        cloud_atten = slab[:, self.off_cld_att:self.off_cld_att + self.cld_att]
        cloud_embedding = slab[:, self.off_cld_emb:self.off_cld_emb + self.cld_emb]

        # ---- image branch outputs ----
        assert image_embedding.ndim == 2
        y["image_embedding"] = image_embedding
        imagefe_output_dict = {"image_atten": image_atten}
        for _k, _v in imagefe_output_dict.items():
            y[_k] = _v

        # ---- cloud branch outputs ----
        assert cloud_embedding.ndim == 2
        y["cloud_embedding"] = cloud_embedding
        cloudfe_output_dict = {"cloud_atten": cloud_atten}

        assert cloud_embedding.shape[0] == image_embedding.shape[0]

        # ---- fusion: vl_atten = cat([image_atten, cloud_atten], dim=1) ----
        # Both attention blocks occupy adjacent lane ranges of the slab, so the
        # concat is a single contiguous slice (no extra kernel, no HBM pass).
        _ = (imagefe_output_dict["image_atten"], cloudfe_output_dict["cloud_atten"])
        y["embedding"] = slab[:, self.off_img_att:
                              self.off_img_att + self.img_att + self.cld_att]
        return y


# -----------------------------------------------------------------------------
# Helpers: weight init + pure-JAX reference for a correctness check
# -----------------------------------------------------------------------------
def _init_fe_weights(key, c_in, cmid, emb_dim, att_dim):
    k1, k2, k3, k4, k5, k6 = jax.random.split(key, 6)
    w1 = jax.random.normal(k1, (c_in, cmid), jnp.float32) * 0.1
    b1 = jax.random.normal(k4, (1, cmid), jnp.float32) * 0.1
    wemb = jax.random.normal(k2, (cmid, emb_dim), jnp.float32) * 0.1
    bemb = jax.random.normal(k5, (1, emb_dim), jnp.float32) * 0.1
    watt = jax.random.normal(k3, (cmid, att_dim), jnp.float32) * 0.1
    batt = jax.random.normal(k6, (1, att_dim), jnp.float32) * 0.1
    return (w1, b1, wemb, bemb, watt, batt)


def _reference_forward(batch, image_weights, cloud_weights):
    w1_i, b1_i, wemb_i, bemb_i, watt_i, batt_i = image_weights
    w1_c, b1_c, wemb_c, bemb_c, watt_c, batt_c = cloud_weights

    imgs = batch["images"]
    B, C, H, W = imgs.shape
    x = jnp.transpose(imgs, (0, 2, 3, 1)).reshape(B, H * W, C)
    h = jnp.maximum(jnp.einsum("bsc,cm->bsm", x, w1_i) + b1_i, 0.0)
    pooled_i = h.mean(axis=1)
    img_emb = pooled_i @ wemb_i + bemb_i
    img_att = jax.nn.sigmoid(pooled_i @ watt_i + batt_i)

    pts = batch["clouds"]
    hc = jnp.maximum(jnp.einsum("bnp,pm->bnm", pts, w1_c) + b1_c, 0.0)
    pooled_c = hc.max(axis=1)
    cld_emb = pooled_c @ wemb_c + bemb_c
    cld_att = jax.nn.sigmoid(pooled_c @ watt_c + batt_c)

    return {"image_embedding": img_emb,
            "image_atten": img_att,
            "cloud_embedding": cld_emb,
            "embedding": jnp.concatenate([img_att, cld_att], axis=1)}


if __name__ == "__main__":
    key = jax.random.PRNGKey(0)
    k_img_w, k_cld_w, k_img_x, k_cld_x = jax.random.split(key, 4)

    # Small shapes consistent with the module's forward contract.
    B, C, H, W = 2, 4, 16, 16         # images, NCHW
    N, P = 64, 3                      # point cloud (B, N, 3)
    CMID = 32
    IMG_EMB, IMG_ATT = 32, 16
    CLD_EMB, CLD_ATT = 32, 16

    image_weights = _init_fe_weights(k_img_w, C, CMID, IMG_EMB, IMG_ATT)
    cloud_weights = _init_fe_weights(k_cld_w, P, CMID, CLD_EMB, CLD_ATT)

    batch = {
        "images": jax.random.normal(k_img_x, (B, C, H, W), jnp.float32),
        "clouds": jax.random.normal(k_cld_x, (B, N, P), jnp.float32),
    }

    model = AdaFusionV2Pallas(image_weights, cloud_weights)
    y = model(batch)
    jax.block_until_ready(y)

    assert y["image_embedding"].shape == (B, IMG_EMB)
    assert y["image_atten"].shape == (B, IMG_ATT)
    assert y["cloud_embedding"].shape == (B, CLD_EMB)
    assert y["embedding"].shape == (B, IMG_ATT + CLD_ATT)

    ref = _reference_forward(batch, image_weights, cloud_weights)
    for k in ("image_embedding", "image_atten", "cloud_embedding", "embedding"):
        np.testing.assert_allclose(np.asarray(y[k]), np.asarray(ref[k]),
                                   rtol=1e-2, atol=1e-2)

    print("KERNEL_OK")
</pallas_src>

<mosaic_0001>
module attributes {stable_mosaic.version = 11 : i64} {
  func.func @fused_adafusion_kernel(%arg0: i32, %arg1: i32, %arg2: memref<1x4x256xf32, #tpu.memory_space<vmem>>, %arg3: memref<1x3x64xf32, #tpu.memory_space<vmem>>, %arg4: memref<32x4xf32, #tpu.memory_space<vmem>>, %arg5: memref<32x1xf32, #tpu.memory_space<vmem>>, %arg6: memref<32x3xf32, #tpu.memory_space<vmem>>, %arg7: memref<32x1xf32, #tpu.memory_space<vmem>>, %arg8: memref<32x128xf32, #tpu.memory_space<vmem>>, %arg9: memref<32x128xf32, #tpu.memory_space<vmem>>, %arg10: memref<1x128xf32, #tpu.memory_space<vmem>>, %arg11: memref<1x1x128xf32, #tpu.memory_space<vmem>>, %arg12: memref<32x1xf32, #tpu.memory_space<vmem>>, %arg13: memref<32x1xf32, #tpu.memory_space<vmem>>) attributes {dimension_semantics = [#tpu.dimension_semantics<parallel>, #tpu.dimension_semantics<arbitrary>], iteration_bounds = array<i64: 2, 1>, scalar_prefetch = 0 : i64, scratch_operands = 2 : i64, tpu.core_type = #tpu.core_type<tc>, window_params = [{transform_indices = @transform_0, window_bounds = array<i64: 1, 4, 256>}, {transform_indices = @transform_1, window_bounds = array<i64: 1, 3, 64>}, {pipeline_mode = #tpu.pipeline_mode<synchronous>, transform_indices = @transform_2, window_bounds = array<i64: 32, 4>}, {pipeline_mode = #tpu.pipeline_mode<synchronous>, transform_indices = @transform_3, window_bounds = array<i64: 32, 1>}, {pipeline_mode = #tpu.pipeline_mode<synchronous>, transform_indices = @transform_4, window_bounds = array<i64: 32, 3>}, {pipeline_mode = #tpu.pipeline_mode<synchronous>, transform_indices = @transform_5, window_bounds = array<i64: 32, 1>}, {pipeline_mode = #tpu.pipeline_mode<synchronous>, transform_indices = @transform_6, window_bounds = array<i64: 32, 128>}, {pipeline_mode = #tpu.pipeline_mode<synchronous>, transform_indices = @transform_7, window_bounds = array<i64: 32, 128>}, {pipeline_mode = #tpu.pipeline_mode<synchronous>, transform_indices = @transform_8, window_bounds = array<i64: 1, 128>}, {transform_indices = @transform_9, window_bounds = array<i64: 1, 1, 128>}]} {
    %c0_i32 = arith.constant 0 : i32
    %0 = arith.cmpi eq, %arg1, %c0_i32 : i32
    %1 = arith.extui %0 : i1 to i32
    %c0_i32_0 = arith.constant 0 : i32
    %2 = arith.cmpi ne, %1, %c0_i32_0 : i32
    scf.if %2 {
      %cst_27 = arith.constant 0.000000e+00 : f32
      %72 = vector.broadcast %cst_27 : f32 to vector<32x1xf32>
      %c0_28 = arith.constant 0 : index
      %c0_29 = arith.constant 0 : index
      %73 = vector.load %arg12[%c0_28, %c0_29] : memref<32x1xf32, #tpu.memory_space<vmem>>, vector<32x1xf32>
      tpu.vector_store %arg12[%c0_28, %c0_29], %72 {strides = array<i32>} : memref<32x1xf32, #tpu.memory_space<vmem>>, vector<32x1xf32>,
      %cst_30 = arith.constant 0xFF800000 : f32
      %74 = vector.broadcast %cst_30 : f32 to vector<32x1xf32>
      %c0_31 = arith.constant 0 : index
      %c0_32 = arith.constant 0 : index
      %75 = vector.load %arg13[%c0_31, %c0_32] : memref<32x1xf32, #tpu.memory_space<vmem>>, vector<32x1xf32>
      tpu.vector_store %arg13[%c0_31, %c0_32], %74 {strides = array<i32>} : memref<32x1xf32, #tpu.memory_space<vmem>>, vector<32x1xf32>,
    } else {
    }
    %c0 = arith.constant 0 : index
    %c0_1 = arith.constant 0 : index
    %c0_2 = arith.constant 0 : index
    %3 = vector.load %arg2[%c0, %c0_1, %c0_2] : memref<1x4x256xf32, #tpu.memory_space<vmem>>, vector<1x4x256xf32>
    %4 = vector.shape_cast %3 : vector<1x4x256xf32> to vector<4x256xf32>
    %c0_3 = arith.constant 0 : index
    %c0_4 = arith.constant 0 : index
    %5 = vector.load %arg4[%c0_3, %c0_4] : memref<32x4xf32, #tpu.memory_space<vmem>>, vector<32x4xf32>
    %c0_5 = arith.constant 0 : index
    %c0_6 = arith.constant 0 : index
    %6 = vector.load %arg5[%c0_5, %c0_6] : memref<32x1xf32, #tpu.memory_space<vmem>>, vector<32x1xf32>
    %7 = vector.extract_strided_slice %5 {offsets = [0, 0], sizes = [32, 1], strides = [1, 1]} : vector<32x4xf32> to vector<32x1xf32>
    %8 = vector.extract_strided_slice %4 {offsets = [0, 0], sizes = [1, 256], strides = [1, 1]} : vector<4x256xf32> to vector<1x256xf32>
    %9 = vector.broadcast %7 : vector<32x1xf32> to vector<32x256xf32>
    %10 = vector.broadcast %8 : vector<1x256xf32> to vector<32x256xf32>
    %11 = arith.mulf %9, %10 : vector<32x256xf32>
    %12 = vector.broadcast %6 : vector<32x1xf32> to vector<32x256xf32>
    %13 = arith.addf %12, %11 : vector<32x256xf32>
    %14 = vector.extract_strided_slice %5 {offsets = [0, 1], sizes = [32, 1], strides = [1, 1]} : vector<32x4xf32> to vector<32x1xf32>
    %15 = vector.extract_strided_slice %4 {offsets = [1, 0], sizes = [1, 256], strides = [1, 1]} : vector<4x256xf32> to vector<1x256xf32>
    %16 = vector.broadcast %14 : vector<32x1xf32> to vector<32x256xf32>
    %17 = vector.broadcast %15 : vector<1x256xf32> to vector<32x256xf32>
    %18 = arith.mulf %16, %17 : vector<32x256xf32>
    %19 = arith.addf %13, %18 : vector<32x256xf32>
    %20 = vector.extract_strided_slice %5 {offsets = [0, 2], sizes = [32, 1], strides = [1, 1]} : vector<32x4xf32> to vector<32x1xf32>
    %21 = vector.extract_strided_slice %4 {offsets = [2, 0], sizes = [1, 256], strides = [1, 1]} : vector<4x256xf32> to vector<1x256xf32>
    %22 = vector.broadcast %20 : vector<32x1xf32> to vector<32x256xf32>
    %23 = vector.broadcast %21 : vector<1x256xf32> to vector<32x256xf32>
    %24 = arith.mulf %22, %23 : vector<32x256xf32>
    %25 = arith.addf %19, %24 : vector<32x256xf32>
    %26 = vector.extract_strided_slice %5 {offsets = [0, 3], sizes = [32, 1], strides = [1, 1]} : vector<32x4xf32> to vector<32x1xf32>
    %27 = vector.extract_strided_slice %4 {offsets = [3, 0], sizes = [1, 256], strides = [1, 1]} : vector<4x256xf32> to vector<1x256xf32>
    %28 = vector.broadcast %26 : vector<32x1xf32> to vector<32x256xf32>
    %29 = vector.broadcast %27 : vector<1x256xf32> to vector<32x256xf32>
    %30 = arith.mulf %28, %29 : vector<32x256xf32>
    %31 = arith.addf %25, %30 : vector<32x256xf32>
    %cst = arith.constant 0.000000e+00 : f32
    %32 = vector.broadcast %cst : f32 to vector<32x256xf32>
    %33 = arith.maximumf %31, %32 : vector<32x256xf32>
    %c0_7 = arith.constant 0 : index
    %c0_8 = arith.constant 0 : index
    %34 = vector.load %arg12[%c0_7, %c0_8] : memref<32x1xf32, #tpu.memory_space<vmem>>, vector<32x1xf32>
    %cst_9 = arith.constant dense<0.000000e+00> : vector<32xf32>
    %35 = vector.multi_reduction <add>, %33, %cst_9 [1] : vector<32x256xf32> to vector<32xf32>
    %36 = vector.shape_cast %35 : vector<32xf32> to vector<32x1xf32>
    %37 = arith.addf %34, %36 : vector<32x1xf32>
    %c0_10 = arith.constant 0 : index
    %c0_11 = arith.constant 0 : index
    %38 = vector.load %arg12[%c0_10, %c0_11] : memref<32x1xf32, #tpu.memory_space<vmem>>, vector<32x1xf32>
    tpu.vector_store %arg12[%c0_10, %c0_11], %37 {strides = array<i32>} : memref<32x1xf32, #tpu.memory_space<vmem>>, vector<32x1xf32>,
    %c0_12 = arith.constant 0 : index
    %c0_13 = arith.constant 0 : index
    %c0_14 = arith.constant 0 : index
    %39 = vector.load %arg3[%c0_12, %c0_13, %c0_14] : memref<1x3x64xf32, #tpu.memory_space<vmem>>, vector<1x3x64xf32>
    %40 = vector.shape_cast %39 : vector<1x3x64xf32> to vector<3x64xf32>
    %c0_15 = arith.constant 0 : index
    %c0_16 = arith.constant 0 : index
    %41 = vector.load %arg6[%c0_15, %c0_16] : memref<32x3xf32, #tpu.memory_space<vmem>>, vector<32x3xf32>
    %c0_17 = arith.constant 0 : index
    %c0_18 = arith.constant 0 : index
    %42 = vector.load %arg7[%c0_17, %c0_18] : memref<32x1xf32, #tpu.memory_space<vmem>>, vector<32x1xf32>
    %43 = vector.extract_strided_slice %41 {offsets = [0, 0], sizes = [32, 1], strides = [1, 1]} : vector<32x3xf32> to vector<32x1xf32>
    %44 = vector.extract_strided_slice %40 {offsets = [0, 0], sizes = [1, 64], strides = [1, 1]} : vector<3x64xf32> to vector<1x64xf32>
    %45 = vector.broadcast %43 : vector<32x1xf32> to vector<32x64xf32>
    %46 = vector.broadcast %44 : vector<1x64xf32> to vector<32x64xf32>
    %47 = arith.mulf %45, %46 : vector<32x64xf32>
    %48 = vector.broadcast %42 : vector<32x1xf32> to vector<32x64xf32>
    %49 = arith.addf %48, %47 : vector<32x64xf32>
    %50 = vector.extract_strided_slice %41 {offsets = [0, 1], sizes = [32, 1], strides = [1, 1]} : vector<32x3xf32> to vector<32x1xf32>
    %51 = vector.extract_strided_slice %40 {offsets = [1, 0], sizes = [1, 64], strides = [1, 1]} : vector<3x64xf32> to vector<1x64xf32>
    %52 = vector.broadcast %50 : vector<32x1xf32> to vector<32x64xf32>
    %53 = vector.broadcast %51 : vector<1x64xf32> to vector<32x64xf32>
    %54 = arith.mulf %52, %53 : vector<32x64xf32>
    %55 = arith.addf %49, %54 : vector<32x64xf32>
    %56 = vector.extract_strided_slice %41 {offsets = [0, 2], sizes = [32, 1], strides = [1, 1]} : vector<32x3xf32> to vector<32x1xf32>
    %57 = vector.extract_strided_slice %40 {offsets = [2, 0], sizes = [1, 64], strides = [1, 1]} : vector<3x64xf32> to vector<1x64xf32>
    %58 = vector.broadcast %56 : vector<32x1xf32> to vector<32x64xf32>
    %59 = vector.broadcast %57 : vector<1x64xf32> to vector<32x64xf32>
    %60 = arith.mulf %58, %59 : vector<32x64xf32>
    %61 = arith.addf %55, %60 : vector<32x64xf32>
    %cst_19 = arith.constant 0.000000e+00 : f32
    %62 = vector.broadcast %cst_19 : f32 to vector<32x64xf32>
    %63 = arith.maximumf %61, %62 : vector<32x64xf32>
    %c0_20 = arith.constant 0 : index
    %c0_21 = arith.constant 0 : index
    %64 = vector.load %arg13[%c0_20, %c0_21] : memref<32x1xf32, #tpu.memory_space<vmem>>, vector<32x1xf32>
    %cst_22 = arith.constant dense<0xFF800000> : vector<32xf32>
    %65 = vector.multi_reduction <maximumf>, %63, %cst_22 [1] : vector<32x64xf32> to vector<32xf32>
    %66 = vector.shape_cast %65 : vector<32xf32> to vector<32x1xf32>
    %67 = arith.maximumf %64, %66 : vector<32x1xf32>
    %c0_23 = arith.constant 0 : index
    %c0_24 = arith.constant 0 : index
    %68 = vector.load %arg13[%c0_23, %c0_24] : memref<32x1xf32, #tpu.memory_space<vmem>>, vector<32x1xf32>
    tpu.vector_store %arg13[%c0_23, %c0_24], %67 {strides = array<i32>} : memref<32x1xf32, #tpu.memory_space<vmem>>, vector<32x1xf32>,
    %c0_i32_25 = arith.constant 0 : i32
    %69 = arith.cmpi eq, %arg1, %c0_i32_25 : i32
    %70 = arith.extui %69 : i1 to i32
    %c0_i32_26 = arith.constant 0 : i32
    %71 = arith.cmpi ne, %70, %c0_i32_26 : i32
    scf.if %71 {
      %c0_27 = arith.constant 0 : index
      %c0_28 = arith.constant 0 : index
      %72 = vector.load %arg12[%c0_27, %c0_28] : memref<32x1xf32, #tpu.memory_space<vmem>>, vector<32x1xf32>
      %cst_29 = arith.constant 3.906250e-03 : f32
      %73 = vector.broadcast %cst_29 : f32 to vector<32x1xf32>
      %74 = arith.mulf %72, %73 : vector<32x1xf32>
      %c0_30 = arith.constant 0 : index
      %c0_31 = arith.constant 0 : index
      %75 = vector.load %arg8[%c0_30, %c0_31] : memref<32x128xf32, #tpu.memory_space<vmem>>, vector<32x128xf32>
      %76 = vector.broadcast %74 : vector<32x1xf32> to vector<32x128xf32>
      %77 = arith.mulf %76, %75 : vector<32x128xf32>
      %cst_32 = arith.constant dense<0.000000e+00> : vector<128xf32>
      %78 = vector.multi_reduction <add>, %77, %cst_32 [0] : vector<32x128xf32> to vector<128xf32>
      %79 = vector.shape_cast %78 : vector<128xf32> to vector<1x128xf32>
      %c0_33 = arith.constant 0 : index
      %c0_34 = arith.constant 0 : index
      %80 = vector.load %arg13[%c0_33, %c0_34] : memref<32x1xf32, #tpu.memory_space<vmem>>, vector<32x1xf32>
      %c0_35 = arith.constant 0 : index
      %c0_36 = arith.constant 0 : index
      %81 = vector.load %arg9[%c0_35, %c0_36] : memref<32x128xf32, #tpu.memory_space<vmem>>, vector<32x128xf32>
      %82 = vector.broadcast %80 : vector<32x1xf32> to vector<32x128xf32>
      %83 = arith.mulf %82, %81 : vector<32x128xf32>
      %cst_37 = arith.constant dense<0.000000e+00> : vector<128xf32>
      %84 = vector.multi_reduction <add>, %83, %cst_37 [0] : vector<32x128xf32> to vector<128xf32>
      %85 = vector.shape_cast %84 : vector<128xf32> to vector<1x128xf32>
      %86 = arith.addf %79, %85 : vector<1x128xf32>
      %c0_38 = arith.constant 0 : index
      %c0_39 = arith.constant 0 : index
      %87 = vector.load %arg10[%c0_38, %c0_39] : memref<1x128xf32, #tpu.memory_space<vmem>>, vector<1x128xf32>
      %88 = arith.addf %86, %87 : vector<1x128xf32>
      %89 = tpu.iota {dimensions = array<i32: 1>} : vector<1x128xi32>
      %c32_i32 = arith.constant 32 : i32
      %90 = vector.broadcast %c32_i32 : i32 to vector<1x128xi32>
      %91 = arith.cmpi sge, %89, %90 : vector<1x128xi32>
      %c64_i32 = arith.constant 64 : i32
      %92 = vector.broadcast %c64_i32 : i32 to vector<1x128xi32>
      %93 = arith.cmpi slt, %89, %92 : vector<1x128xi32>
      %94 = arith.andi %91, %93 : vector<1x128xi1>
      %95 = arith.negf %88 : vector<1x128xf32>
      %96 = math.exp %95 : vector<1x128xf32>
      %cst_40 = arith.constant 1.000000e+00 : f32
      %97 = vector.broadcast %cst_40 : f32 to vector<1x128xf32>
      %98 = arith.addf %97, %96 : vector<1x128xf32>
      %99 = arith.divf %97, %98 : vector<1x128xf32>
      %100 = arith.select %94, %99, %88 : vector<1x128xi1>, vector<1x128xf32>
      %c0_41 = arith.constant 0 : index
      %c0_42 = arith.constant 0 : index
      %c0_43 = arith.constant 0 : index
      %101 = vector.load %arg11[%c0_41, %c0_42, %c0_43] : memref<1x1x128xf32, #tpu.memory_space<vmem>>, vector<1x1x128xf32>
      %102 = vector.shape_cast %101 : vector<1x1x128xf32> to vector<1x128xf32>
      %103 = vector.shape_cast %100 : vector<1x128xf32> to vector<1x1x128xf32>
      tpu.vector_store %arg11[%c0_41, %c0_42, %c0_43], %103 {strides = array<i32>} : memref<1x1x128xf32, #tpu.memory_space<vmem>>, vector<1x1x128xf32>,
    } else {
    }
    return
  }
  func.func @transform_0(%arg0: i32, %arg1: i32) -> (i32, i32, i32) {
    %c0_i32 = arith.constant 0 : i32
    %c0_i32_0 = arith.constant 0 : i32
    return %arg0, %c0_i32, %arg1 : i32, i32, i32
  }
  func.func @transform_1(%arg0: i32, %arg1: i32) -> (i32, i32, i32) {
    %c0_i32 = arith.constant 0 : i32
    %c0_i32_0 = arith.constant 0 : i32
    return %arg0, %c0_i32, %arg1 : i32, i32, i32
  }
  func.func @transform_2(%arg0: i32, %arg1: i32) -> (i32, i32) {
    %c0_i32 = arith.constant 0 : i32
    %c0_i32_0 = arith.constant 0 : i32
    %c0_i32_1 = arith.constant 0 : i32
    return %c0_i32, %c0_i32_0 : i32, i32
  }
  func.func @transform_3(%arg0: i32, %arg1: i32) -> (i32, i32) {
    %c0_i32 = arith.constant 0 : i32
    %c0_i32_0 = arith.constant 0 : i32
    %c0_i32_1 = arith.constant 0 : i32
    return %c0_i32, %c0_i32_0 : i32, i32
  }
  func.func @transform_4(%arg0: i32, %arg1: i32) -> (i32, i32) {
    %c0_i32 = arith.constant 0 : i32
    %c0_i32_0 = arith.constant 0 : i32
    %c0_i32_1 = arith.constant 0 : i32
    return %c0_i32, %c0_i32_0 : i32, i32
  }
  func.func @transform_5(%arg0: i32, %arg1: i32) -> (i32, i32) {
    %c0_i32 = arith.constant 0 : i32
    %c0_i32_0 = arith.constant 0 : i32
    %c0_i32_1 = arith.constant 0 : i32
    return %c0_i32, %c0_i32_0 : i32, i32
  }
  func.func @transform_6(%arg0: i32, %arg1: i32) -> (i32, i32) {
    %c0_i32 = arith.constant 0 : i32
    %c0_i32_0 = arith.constant 0 : i32
    %c0_i32_1 = arith.constant 0 : i32
    return %c0_i32, %c0_i32_0 : i32, i32
  }
  func.func @transform_7(%arg0: i32, %arg1: i32) -> (i32, i32) {
    %c0_i32 = arith.constant 0 : i32
    %c0_i32_0 = arith.constant 0 : i32
    %c0_i32_1 = arith.constant 0 : i32
    return %c0_i32, %c0_i32_0 : i32, i32
  }
  func.func @transform_8(%arg0: i32, %arg1: i32) -> (i32, i32) {
    %c0_i32 = arith.constant 0 : i32
    %c0_i32_0 = arith.constant 0 : i32
    %c0_i32_1 = arith.constant 0 : i32
    return %c0_i32, %c0_i32_0 : i32, i32
  }
  func.func @transform_9(%arg0: i32, %arg1: i32) -> (i32, i32, i32) {
    %c0_i32 = arith.constant 0 : i32
    %c0_i32_0 = arith.constant 0 : i32
    %c0_i32_1 = arith.constant 0 : i32
    return %arg0, %c0_i32, %c0_i32_0 : i32, i32, i32
  }
}

</mosaic_0001>

<bundles_post_ra>
// kernel: tpu_custom_call.1
= control target key start
LH: loop header
LB: loop body
LE: loop exit
PB: predicated region body
PF: predicated region fallthrough
CT: control target
= control target key end

     0   :  { %14 = vsyncpa [#allocation5], 0  ;;  %s1508_s0 = inlined_call_operand.vmem [shape: f32[2,4,256], index: 0, kind: input, shape index: {}]   ;;  %s1509_s1 = inlined_call_operand.vmem [shape: f32[2,3,64], index: 1, kind: input, shape index: {}]   ;;  %s1510_s2 = inlined_call_operand.vmem [shape: f32[32,4], index: 2, kind: input, shape index: {}]   ;;  %s1511_s3 = inlined_call_operand.vmem [shape: f32[32,1], index: 3, kind: input, shape index: {}]   ;;  %s1512_s4 = inlined_call_operand.vmem [shape: f32[32,3], index: 4, kind: input, shape index: {}]   ;;  %s1513_s5 = inlined_call_operand.vmem [shape: f32[32,1], index: 5, kind: input, shape index: {}]   ;;  %s1514_s6 = inlined_call_operand.vmem [shape: f32[32,128], index: 6, kind: input, shape index: {}]   ;;  %s1515_s7 = inlined_call_operand.vmem [shape: f32[32,128], index: 7, kind: input, shape index: {}]   ;;  %s1516_s8 = inlined_call_operand.vmem [shape: f32[1,128], index: 8, kind: input, shape index: {}]   ;;  %s1517_s9 = inlined_call_operand.hbm [shape: f32[2,1,128], index: 9, kind: output, shape index: {}]  }
   0x1   :  { %16 = vsyncpa [#allocation5 + $0x1], 0  ;;  %s1206_s30 = smov 0   ;;  %s1208_s10 = smov 0  }
   0x2   :  { %s1210_s11 = smov 0   ;;  %s1212_s12 = smov 0  }
   0x3   :  { %s1214_s13 = smov 0   ;;  %s1216_s14 = smov 0  }
   0x4 LB: > { %s970_s15 = sadd.s32 4294967295, %s1148_s14   ;;  %s971_s16 = sadd.s32 4294967294, %s1148_s14   ;;  %s1148_s14 = sphi %s1216_s14, %s22_s14   ;;  %s1144_s13 = sphi %s1214_s13, %s1524_s13   ;;  %s1140_s12 = sphi %s1212_s12, %s1523_s12   ;;  %s1136_s11 = sphi %s1210_s11, %s1522_s11   ;;  %s1132_s10 = sphi %s1208_s10, %s1521_s10   ;;  %s1128_s30 = sphi %s1206_s30, %s1520_s30  }
   0x5   : > { %s34_s17 = sadd.s32 1, %s1144_s13  ;;  %s244_s18 = sadd.s32 1, %s1136_s11 }
   0x6   : > { %p36_p0 = scmp.ge.s32.totalorder %s34_s17, 2  ;;  %p254_p1 = scmp.ne.s32.totalorder %s1136_s11, %s1132_s10 }
   0x7   : > { %p255_p2 = scmp.eq.s32.totalorder %s970_s15, 1  ;;  %p260_p3 = scmp.ne.s32.totalorder %s1132_s10, %s1128_s30 }
   0x8   : > { %s1526_s17 = smov (%p36_p0, %s34_s17), 0  ;;  %p261_p5 = scmp.eq.s32.totalorder %s971_s16, 1 }
   0x9   : > { %p1246_p4 = por %p255_p2, %p254_p1  ;;  %s241_s20 = ssub.s32 %s1144_s13, %s1526_s17 }
   0xa   : > { %p974_p6 = scmp.ge.s32.totalorder %s1148_s14, 1  ;;  %p242_p7 = scmp.eq.s32.totalorder %s241_s20, 0 }
   0xb   : > { %p1253_p8 = por %p261_p5, %p260_p3  ;;  %p323_p9 = scmp.lt.s32.totalorder %s1148_s14, 3 }
   0xc   : > { %s1259_s22 = scalar_select %p242_p7, %s1136_s11, %s244_s18  }
   0xd   : > { %p324_p10 = pnand %p974_p6, %p323_p9 }
   0xe   : > { %p370_p11 = scmp.lt.s32.totalorder (!%p324_p10), %s1140_s12, 1  ;;  %s1090_s28 = scalar_lea.hbm (!%p324_p10), %s1517_s9, 2 }
   0xf   : > { %327 = sbr.rel (%p324_p10) target bundleno = 546 (0x222), region = 56 }
  0x14   : > { %v404_v0 = vld [vmem:[%s1511_s3] sm:$0xff]  ;;  %v403_v1 = vld [vmem:[%s1510_s2 + $0x18] sm:$0xff]  ;;  %v402_v2 = vld [vmem:[%s1510_s2 + $0x10] sm:$0xff]  ;;  %v1150_v3 = vmov 3   ;;  %v1151_v4 = vmov 0   ;;  %v1152_v9 = vmov 1  }
  0x15   : > { %1051 = vset.pattern.permute.xlu0 %v1150_v3  ;;  %1044 = vset.pattern.permute.xlu2 %v1151_v4  ;;  %v405_v5 = vld [vmem:[%s1511_s3 + $0x8] sm:$0xff]  ;;  %v400_v6 = vld [vmem:[%s1510_s2] sm:$0xff]  ;;  %v407_v7 = vld [vmem:[%s1511_s3 + $0x18] sm:$0xff]  ;;  %v1153_v12 = vmov 2   ;;  %s1330_s20 = scalar_select %p370_p11, %s1140_s12, 1  ;;  %vm734_vm0 = vcmask 523264  }
  0x16   : > { %1043 = vset.pattern.permute.xlu1 %v1151_v4  ;;  %445 = vperm.xlu2 %1044, %v404_v0   ;;  %v401_v8 = vld [vmem:[%s1510_s2 + $0x8] sm:$0xff]  ;;  %v406_v10 = vld [vmem:[%s1511_s3 + $0x10] sm:$0xff]  ;;  %v619_v13 = vld [vmem:[%s1512_s4] sm:$0xff]  ;;  %vm390_vm1 = vcmask 7168  }
  0x17   : > { %560 = vperm.xlu0 %1051, %v403_v1   ;;  %420 = vperm.xlu1 %1043, %v402_v2   ;;  %v621_v11 = vld [vmem:[%s1512_s4 + $0x10] sm:$0xff]  ;;  %v620_v15 = vld [vmem:[%s1512_s4 + $0x8] sm:$0xff]  ;;  %v623_v16 = vld [vmem:[%s1513_s5] sm:$0xff]  ;;  %s981_s23 = sshll.u32 %s1330_s20, 3  ;;  %s977_s27 = sshll.u32 %s1330_s20, 2 }
  0x18   : > { %v625_v14 = vld [vmem:[%s1513_s5 + $0x10] sm:$0xff]  ;;  %v622_v17 = vld [vmem:[%s1512_s4 + $0x18] sm:$0xff]  ;;  %v624_v18 = vld [vmem:[%s1513_s5 + $0x8] sm:$0xff]  ;;  %s377_s26 = scalar_lea.vmem %s1508_s0, %s981_s23  ;;  %s385_s15 = scalar_lea.vmem %s1509_s1, %s977_s27 }
  0x19   : > { %v626_v25 = vld [vmem:[%s1513_s5 + $0x18] sm:$0xff]  ;;  %v399_v31 = vld [vmem:[%s377_s26] sm:$0xff]  ;;  %s367_s27 = sand.u32 1, %s1132_s10  }
  0x1a   : > { %v429_v32 = vperm.slane %v399_v31, 0  ;;  %v430_v33 = vperm.slane %v399_v31, 4  ;;  %v487_v37 = vperm.slane %v399_v31, 1  ;;  %v488_v38 = vperm.slane %v399_v31, 5  ;;  %s368_s16 = scalar_lea.vmem [#allocation4], %s367_s27 }
  0x1b   : > { %v525_v46 = vperm.slane %v399_v31, 2  ;;  %v526_v47 = vperm.slane %v399_v31, 6  ;;  %v563_v48 = vperm.slane %v399_v31, 3  ;;  %v564_v49 = vperm.slane %v399_v31, 7  ;;  %s884_s18 = sshll.u32 %s368_s16, 4  ;;  %s885_s18 = int_to_ptr.vmem [resolvable:$true] %s884_s18 }
  0x1c   : > { %v1339_v35 = vperm.slane %v429_v32, 0  ;;  %v1341_v36 = vperm.slane %v430_v33, 0  ;;  %v1352_v44 = vperm.slane %v487_v37, 1  ;;  %v1354_v45 = vperm.slane %v488_v38, 1 }
  0x1d   : > { %v1358_v54 = vperm.slane %v525_v46, 2  ;;  %v1360_v55 = vperm.slane %v526_v47, 2  ;;  %v1364_v57 = vperm.slane %v563_v48, 3  ;;  %v1366_v58 = vperm.slane %v564_v49, 3 }
  0x1e   : > { %450 = vperm.xlu2 %1044, %v405_v5  }
  0x1f   : > { %1052 = vset.pattern.permute.xlu0 %v1151_v4  ;;  %425 = vperm.xlu1 %1043, %v403_v1  }
  0x20   : > { %410 = vperm.xlu0 %1052, %v400_v6  }
  0x26   : > { %1045 = vset.pattern.permute.xlu2 %v1152_v9 }
  0x27   : > { %460 = vperm.xlu1 %1043, %v407_v7   ;;  %472 = vperm.xlu2 %1045, %v400_v6  }
  0x28   : > { %415 = vperm.xlu0 %1052, %v401_v8  }
  0x2f   : > { %1046 = vset.pattern.permute.xlu1 %v1152_v9  ;;  %484 = vperm.xlu2 %1045, %v403_v1  }
  0x30   : > { %480 = vperm.xlu1 %1046, %v402_v2   ;;  %455 = vperm.xlu0 %1052, %v406_v10  }
  0x37   : > { %1048 = vset.pattern.permute.xlu2 %v1153_v12 }
  0x38   : > { %1047 = vset.pattern.permute.xlu1 %v1153_v12  ;;  %639 = vperm.xlu0 %1052, %v621_v11  }
  0x39   : > { %510 = vperm.xlu1 %1047, %v400_v6   ;;  %514 = vperm.xlu2 %1048, %v401_v8  }
  0x40   : > { %1054 = vset.pattern.permute.xlu0 %v1152_v9 }
  0x41   : > { %476 = vperm.xlu0 %1054, %v401_v8   ;;  %522 = vperm.xlu1 %1047, %v403_v1  }
  0x42   : > { %1049 = vset.pattern.permute.xlu2 %v1150_v3 }
  0x43   : > { %548 = vperm.xlu2 %1049, %v400_v6  }
  0x49   : > { %677 = vperm.xlu0 %1054, %v619_v13   ;;  %1050 = vset.pattern.permute.xlu1 %v1150_v3 }
  0x4a   : > { %552 = vperm.xlu1 %1050, %v401_v8  }
  0x4b   : > { %556 = vperm.xlu2 %1049, %v402_v2  }
  0x51   : > { %685 = vperm.xlu0 %1054, %v621_v11  }
  0x52   : > { %1057 = vset.pattern.permute.xlu1 %v1151_v4 }
  0x53   : > { %1053 = vset.pattern.permute.xlu2 %v1151_v4  ;;  %664 = vperm.xlu1 %1057, %v625_v14  }
  0x54   : > { %629 = vperm.xlu2 %1053, %v619_v13  }
  0x59   : > { %1058 = vset.pattern.permute.xlu0 %v1153_v12 }
  0x5a   : > { %518 = vperm.xlu0 %1058, %v402_v2  }
  0x5b   : > { %1062 = vset.pattern.permute.xlu1 %v1153_v12 }
  0x5c   : > { %634 = vperm.xlu2 %1053, %v620_v15   ;;  %710 = vperm.xlu1 %1062, %v621_v11  }
  0x62   : > { %706 = vperm.xlu0 %1058, %v620_v15  }
  0x64   : > { %654 = vperm.xlu2 %1053, %v623_v16   ;;  %1064 = vset.pattern.permute.xlu1 %v1151_v4 }
  0x6a   : > { %714 = vperm.xlu0 %1058, %v622_v17  }
  0x6c   : > { %659 = vperm.xlu2 %1053, %v624_v18  }
  0x70   : > { %v446_v19 = vpop.permute.xlu2 %445 }
  0x72   : > { %1063 = vset.pattern.permute.xlu0 %v1151_v4 }
  0x74   : > { %1055 = vset.pattern.permute.xlu2 %v1152_v9 }
  0x75   : > { %681 = vperm.xlu2 %1055, %v620_v15  }
  0x78   : > { %v1317_v20 = vpop.permute.xlu2 %450 }
  0x7d   : > { %1056 = vset.pattern.permute.xlu2 %v1151_v4 }
  0x7e   : > { %644 = vperm.xlu2 %1056, %v622_v17  }
  0x81   : > { %v473_v21 = vpop.permute.xlu2 %472 }
  0x82   : > { %v493_v52 = vmul.f32 %v1352_v44, %v473_v21  ;;  %v494_v53 = vmul.f32 %v1354_v45, %v473_v21 }
  0x86   : > { %1059 = vset.pattern.permute.xlu2 %v1153_v12 }
  0x87   : > { %702 = vperm.xlu2 %1059, %v619_v13  }
  0x89   : > { %v1320_v22 = vpop.permute.xlu1 %420  ;;  %v1322_v23 = vpop.permute.xlu0 %560 }
  0x8a   : > { %v485_v24 = vpop.permute.xlu2 %484  ;;  %v576_v32 = vmul.f32 %v1366_v58, %v1322_v23 }
  0x8b   : > { %v499_v11 = vmul.f32 %v1352_v44, %v485_v24  ;;  %v500_v12 = vmul.f32 %v1354_v45, %v485_v24  ;;  %v575_v24 = vmul.f32 %v1364_v57, %v1322_v23 }
  0x8f   : > { %1060 = vset.pattern.permute.xlu2 %v1151_v4 }
  0x90   : > { %669 = vperm.xlu2 %1060, %v626_v25  }
  0x91   : > { %v426_v26 = vpop.permute.xlu1 %425 }
  0x92   : > { %v411_v27 = vpop.permute.xlu0 %410  ;;  %v441_v59 = vmul.f32 %v1339_v35, %v426_v26  ;;  %v442_v60 = vmul.f32 %v1341_v36, %v426_v26 }
  0x93   : > { %v1332_v28 = vpop.permute.xlu2 %514  ;;  %v435_v41 = vmul.f32 %v1339_v35, %v411_v27  ;;  %v436_v42 = vmul.f32 %v1341_v36, %v411_v27 }
  0x94   : > { %v534_v23 = vmul.f32 %v1360_v55, %v1332_v28 }
  0x95   : > { %v463_v50 = vadd.f32 %v446_v19, %v435_v41  ;;  %v464_v51 = vadd.f32 %v446_v19, %v436_v42 }
  0x97   : > { %v501_v62 = vadd.f32 %v493_v52, %v463_v50  ;;  %v502_v63 = vadd.f32 %v494_v53, %v464_v51  ;;  %v533_v50 = vmul.f32 %v1358_v54, %v1332_v28  ;;  %v439_v28 = vmul.f32 %v1339_v35, %v1320_v22 }
  0x98   : > { %1061 = vset.pattern.permute.xlu2 %v1152_v9 }
  0x99   : > { %689 = vperm.xlu2 %1061, %v622_v17   ;;  %v461_v29 = vpop.permute.xlu1 %460 }
  0x9a   : > { %v416_v30 = vpop.permute.xlu0 %415  ;;  %v469_v7 = vadd.f32 %v461_v29, %v441_v59  ;;  %v470_v8 = vadd.f32 %v461_v29, %v442_v60 }
  0x9b   : > { %v437_v15 = vmul.f32 %v1339_v35, %v416_v30  ;;  %v438_v16 = vmul.f32 %v1341_v36, %v416_v30 }
  0x9c   : > { %v507_v19 = vadd.f32 %v499_v11, %v469_v7  ;;  %v508_v21 = vadd.f32 %v500_v12, %v470_v8  ;;  %v618_v12 = vld [vmem:[%s385_s15] sm:$0x7]  ;;  %s882_s15 = scalar_lea.hbm %s1517_s9, %s1140_s12  ;;  %s874_s12 = scalar_lea.sflag [#allocation5], %s367_s27 }
  0x9d   : > { %v549_v34 = vpop.permute.xlu2 %548  ;;  %v465_v37 = vadd.f32 %v1317_v20, %v437_v15  ;;  %v466_v38 = vadd.f32 %v1317_v20, %v438_v16  ;;  %v647_v16 = vperm.slane %v618_v12, 0  ;;  %s886_s20 = sshll.u32 %s882_s15, 4  ;;  %s887_s20 = int_to_ptr.hbm [resolvable:$true] %s886_s20 }
  0x9e   : > { %v569_v2 = vmul.f32 %v1364_v57, %v549_v34  ;;  %v570_v3 = vmul.f32 %v1366_v58, %v549_v34  ;;  %s1084_s23 = sshra.s32 %s887_s20, 4  ;;  %s1085_s23 = int_to_ptr.hbm [resolvable:$true] %s1084_s23 }
  0x9f   : > { %s1086_s24 = scalar_lea.hbm %s1085_s23, 1  ;;  %p1091_p1 = scmp.lt.s32.totalorder %s1085_s23, %s1517_s9 }
  0xa0   : > { %p1087_p12 = scmp.ne.s32.totalorder %s1085_s23, %s1086_s24  ;;  %p1092_p2 = scmp.lt.s32.totalorder %s1090_s28, %s1086_s24 }
  0xa1   : > { %1065 = vset.pattern.permute.xlu2 %v1151_v4 }
  0xa2   : > { %v1344_v39 = vpop.permute.xlu1 %480  ;;  %v1346_v40 = vpop.permute.xlu0 %455  ;;  %p1088_p13 = pnand %p1087_p12, %p1246_p4  ;;  %p1093_p3 = por %p1092_p2, %p1091_p1 }
  0xa3   : > { %v497_v8 = vmul.f32 %v1352_v44, %v1344_v39 }
  0xa4   : > { %p1089_p0 = pneg %p1088_p13 }
  0xa5   : > { %v1350_v43 = vpop.permute.xlu2 %556 }
  0xa6   : > { %p1094_p5 = pnand %p1093_p3, %p1089_p0 }
  0xaa   : > { %v1362_v56 = vpop.permute.xlu0 %639 }
  0xab   : > { %v511_v61 = vpop.permute.xlu1 %510 }
  0xac   : > { %v531_v0 = vmul.f32 %v1358_v54, %v511_v61  ;;  %v532_v1 = vmul.f32 %v1360_v55, %v511_v61 }
  0xae   : > { %v539_v4 = vadd.f32 %v531_v0, %v501_v62  ;;  %v540_v5 = vadd.f32 %v532_v1, %v502_v63  ;;  %v1374_v6 = vpop.permute.xlu2 %629 }
  0xb0   : > { %v577_v9 = vadd.f32 %v569_v2, %v539_v4  ;;  %v578_v10 = vadd.f32 %v570_v3, %v540_v5  ;;  %v440_v5 = vmul.f32 %v1341_v36, %v1320_v22 }
  0xb2   : > { %v585_v13 = vmax.f32 %v577_v9, 0.0  ;;  %v586_v14 = vmax.f32 %v578_v10, 0.0  ;;  %v498_v9 = vmul.f32 %v1354_v45, %v1344_v39  ;;  %v467_v10 = vadd.f32 %v1346_v40, %v439_v28 }
  0xb3   : > { %v477_v17 = vpop.permute.xlu0 %476  ;;  %v523_v18 = vpop.permute.xlu1 %522  ;;  %v468_v35 = vadd.f32 %v1346_v40, %v440_v5  ;;  %v574_v39 = vmul.f32 %v1366_v58, %v1350_v43 }
  0xb4   : > { %v537_v25 = vmul.f32 %v1358_v54, %v523_v18  ;;  %v538_v26 = vmul.f32 %v1360_v55, %v523_v18  ;;  %v495_v27 = vmul.f32 %v1352_v44, %v477_v17  ;;  %v496_v29 = vmul.f32 %v1354_v45, %v477_v17 }
  0xb5   : > { %v597_v31 = vadd.f32 %v586_v14, %v585_v13  ;;  %v505_v36 = vadd.f32 %v497_v8, %v467_v10  ;;  %v506_v13 = vadd.f32 %v498_v9, %v468_v35  ;;  %v692_v17 = vperm.slane %v618_v12, 1 }
  0xb6   : > { %v545_v30 = vadd.f32 %v537_v25, %v507_v19  ;;  %v546_v33 = vadd.f32 %v538_v26, %v508_v21  ;;  %v635_v34 = vpop.permute.xlu2 %634  ;;  %v503_v46 = vadd.f32 %v495_v27, %v465_v37  ;;  %v504_v47 = vadd.f32 %v496_v29, %v466_v38 }
  0xb7   : > { %598 = vadd.xlane.f32.xlu1 %v597_v31  ;;  %v573_v44 = vmul.f32 %v1364_v57, %v1350_v43  ;;  %v649_v19 = vmul.f32 %v647_v16, %v635_v34  ;;  %v650_v27 = vmul.f32 %v647_v16, %v1362_v56  ;;  %v717_v29 = vperm.slane %v618_v12, 2 }
  0xb8   : > { %v583_v41 = vadd.f32 %v575_v24, %v545_v30  ;;  %v584_v42 = vadd.f32 %v576_v32, %v546_v33  ;;  %v541_v20 = vadd.f32 %v533_v50, %v503_v46  ;;  %v542_v59 = vadd.f32 %v534_v23, %v504_v47 }
  0xb9   : > { %v648_v47 = vmul.f32 %v647_v16, %v1374_v6  ;;  %v1155_v9 = vmov -inf  }
  0xba   : > { %v591_v48 = vmax.f32 %v583_v41, 0.0  ;;  %v592_v49 = vmax.f32 %v584_v42, 0.0  ;;  %396 = vst.msk [vmem:[#allocation3 + $0x8] sm:$0xff] %vm390_vm1, %v1155_v9 }
  0xbb   : > { %v1394_v51 = vpop.permute.xlu0 %677  ;;  %395 = vst.msk [vmem:[#allocation3] sm:$0xff] %vm390_vm1, %v1155_v9 }
  0xbc   : > { %v553_v52 = vpop.permute.xlu1 %552  ;;  %v1396_v53 = vadd.f32 %v592_v49, %v591_v48  ;;  %v1154_v49 = vmov 0.0   ;;  %v693_v23 = vmul.f32 %v692_v17, %v1394_v51  ;;  %397 = vst.msk [vmem:[#allocation3 + $0x10] sm:$0xff] %vm390_vm1, %v1155_v9 }
  0xbd   : > { %v571_v60 = vmul.f32 %v1364_v57, %v553_v52  ;;  %v572_v61 = vmul.f32 %v1366_v58, %v553_v52  ;;  %391 = vst.msk [vmem:[#allocation2] sm:$0xff] %vm390_vm1, %v1154_v49 }
  0xbe   : > { %v655_v62 = vpop.permute.xlu2 %654  ;;  %392 = vst.msk [vmem:[#allocation2 + $0x8] sm:$0xff] %vm390_vm1, %v1154_v49 }
  0xbf   : > { %v579_v63 = vadd.f32 %v571_v60, %v541_v20  ;;  %v580_v0 = vadd.f32 %v572_v61, %v542_v59  ;;  %v672_v48 = vadd.f32 %v655_v62, %v648_v47  ;;  %393 = vst.msk [vmem:[#allocation2 + $0x10] sm:$0xff] %vm390_vm1, %v1154_v49  ;;  %v767_v47 = vld [vmem:[%s1514_s6 + $0x8] sm:$0xff] }
  0xc0   : > { %394 = vst.msk [vmem:[#allocation2 + $0x18] sm:$0xff] %vm390_vm1, %v1154_v49  ;;  %v768_v49 = vld [vmem:[%s1514_s6 + $0x10] sm:$0xff] }
  0xc1   : > { %v587_v1 = vmax.f32 %v579_v63, 0.0  ;;  %v588_v2 = vmax.f32 %v580_v0, 0.0  ;;  %v697_v20 = vadd.f32 %v693_v23, %v672_v48  ;;  %398 = vst.msk [vmem:[#allocation3 + $0x18] sm:$0xff] %vm390_vm1, %v1155_v9  ;;  %v766_v48 = vld [vmem:[%s1514_s6] sm:$0xff] }
  0xc3   : > { %v686_v3 = vpop.permute.xlu0 %685  ;;  %v600_v4 = vadd.f32 %v588_v2, %v587_v1 }
  0xc4   : > { %v695_v43 = vmul.f32 %v692_v17, %v686_v3  ;;  %v593_v8 = vld [vmem:[#allocation2] sm:$0xff] }
  0xc5   : > { %601 = vadd.xlane.f32.xlu2 %v600_v4  ;;  %v665_v11 = vpop.permute.xlu1 %664 }
  0xc6   : > { %v660_v7 = vpop.permute.xlu2 %659  ;;  %v674_v30 = vadd.f32 %v665_v11, %v650_v27  ;;  %v594_v11 = vld [vmem:[#allocation2 + $0x8] sm:$0xff] }
  0xc8   : > { %v699_v41 = vadd.f32 %v695_v43, %v674_v30  ;;  %v733_v43 = vld [vmem:[#allocation3 + $0x18] sm:$0xff] }
  0xcc   : > { %v519_v22 = vpop.permute.xlu0 %518 }
  0xcd   : > { %v535_v14 = vmul.f32 %v1358_v54, %v519_v22  ;;  %v536_v15 = vmul.f32 %v1360_v55, %v519_v22  ;;  %v673_v54 = vadd.f32 %v660_v7, %v649_v19 }
  0xce   : > { %v711_v24 = vpop.permute.xlu1 %710 }
  0xcf   : > { %v543_v45 = vadd.f32 %v535_v14, %v505_v36  ;;  %v544_v18 = vadd.f32 %v536_v15, %v506_v13  ;;  %v682_v40 = vpop.permute.xlu2 %681  ;;  %v720_v58 = vmul.f32 %v717_v29, %v711_v24  ;;  %v595_v14 = vld [vmem:[#allocation2 + $0x10] sm:$0xff] }
  0xd0   : > { %v694_v21 = vmul.f32 %v692_v17, %v682_v40 }
  0xd1   : > { %v581_v25 = vadd.f32 %v573_v44, %v543_v45  ;;  %v582_v26 = vadd.f32 %v574_v39, %v544_v18  ;;  %v724_v46 = vadd.f32 %v720_v58, %v699_v41  ;;  %v596_v45 = vld [vmem:[#allocation2 + $0x18] sm:$0xff] }
  0xd2   : > { %v698_v57 = vadd.f32 %v694_v21, %v673_v54  ;;  %v732_v21 = vld [vmem:[#allocation3 + $0x10] sm:$0xff] }
  0xd3   : > { %v589_v55 = vmax.f32 %v581_v25, 0.0  ;;  %v590_v31 = vmax.f32 %v582_v26, 0.0  ;;  %v728_v50 = vmax.f32 %v724_v46, 0.0 }
  0xd4   : > { %v707_v32 = vpop.permute.xlu0 %706 }
  0xd5   : > { %v719_v33 = vmul.f32 %v717_v29, %v707_v32  ;;  %v603_v37 = vadd.f32 %v590_v31, %v589_v55  ;;  %v741_v59 = vsel %vm734_vm0, %v728_v50, -inf }
  0xd7   : > { %v723_v38 = vadd.f32 %v719_v33, %v698_v57  ;;  %604 = vadd.xlane.f32.xlu1 %v603_v37 }
  0xd8   : > { %v645_v34 = vpop.permute.xlu2 %644 }
  0xd9   : > { %v727_v42 = vmax.f32 %v723_v38, 0.0  ;;  %v651_v63 = vmul.f32 %v647_v16, %v645_v34 }
  0xdb   : > { %v738_v56 = vsel %vm734_vm0, %v727_v42, -inf }
  0xdc   : > { %739 = vmax.xlane.f32.xlu2 %v738_v56  ;;  %v715_v0 = vpop.permute.xlu0 %714 }
  0xdd   : > { %v721_v3 = vmul.f32 %v717_v29, %v715_v0 }
  0xdf   : > { %607 = vadd.xlane.f32.xlu1 %v1396_v53 }
  0xe1   : > { %v703_v52 = vpop.permute.xlu2 %702 }
  0xe2   : > { %v718_v6 = vmul.f32 %v717_v29, %v703_v52  ;;  %v730_v29 = vld [vmem:[#allocation3] sm:$0xff] }
  0xe4   : > { %v722_v60 = vadd.f32 %v718_v6, %v697_v20  ;;  %742 = vmax.xlane.f32.xlu2 %v741_v59  ;;  %v769_v6 = vld [vmem:[%s1514_s6 + $0x18] sm:$0xff] }
  0xe6   : > { %v726_v61 = vmax.f32 %v722_v60, 0.0 }
  0xe8   : > { %v735_v62 = vsel %vm734_vm0, %v726_v61, -inf }
  0xe9   : > { %736 = vmax.xlane.f32.xlu0 %v735_v62 }
  0xea   : > { %v670_v53 = vpop.permute.xlu2 %669 }
  0xeb   : > { %v675_v51 = vadd.f32 %v670_v53, %v651_v63  ;;  %v807_v53 = vld [vmem:[%s1515_s7] sm:$0xff] }
  0xf3   : > { %v690_v1 = vpop.permute.xlu2 %689 }
  0xf4   : > { %v696_v2 = vmul.f32 %v692_v17, %v690_v1  ;;  %v731_v17 = vld [vmem:[#allocation3 + $0x8] sm:$0xff] }
  0xf5   : > { %v808_v1 = vld [vmem:[%s1515_s7 + $0x8] sm:$0xff] }
  0xf6   : > { %v700_v4 = vadd.f32 %v696_v2, %v675_v51 }
  0xf8   : > { %v725_v28 = vadd.f32 %v721_v3, %v700_v4  ;;  %v809_v4 = vld [vmem:[%s1515_s7 + $0x10] sm:$0xff] }
  0xfa   : > { %v729_v5 = vmax.f32 %v725_v28, 0.0 }
  0xfc   : > { %v744_v7 = vsel %vm734_vm0, %v729_v5, -inf  ;;  %v810_v5 = vld [vmem:[%s1515_s7 + $0x18] sm:$0xff] }
  0xfd   : > { %745 = vmax.xlane.f32.xlu0 %v744_v7 }
 0x12a   : > { %v599_v10 = vpop.xlane.xlu1 %598 }
 0x12b   : > { %v609_v35 = vadd.f32 %v599_v10, %v593_v8 }
 0x12d   : > { %614 = vst.msk [vmem:[#allocation2] sm:$0xff] %vm390_vm1, %v609_v35 }
 0x134   : > { %v758_v57 = vld [vmem:[#allocation2] sm:$0xff] }
 0x135   : > { %v762_v37 = vmul.f32 0.00390625, %v758_v57 }
 0x138   : > { %v602_v12 = vpop.xlane.xlu2 %601 }
 0x139   : > { %v610_v22 = vadd.f32 %v602_v12, %v594_v11 }
 0x13b   : > { %615 = vst.msk [vmem:[#allocation2 + $0x8] sm:$0xff] %vm390_vm1, %v610_v22 }
 0x142   : > { %v759_v36 = vld [vmem:[#allocation2 + $0x8] sm:$0xff] }
 0x143   : > { %v763_v13 = vmul.f32 0.00390625, %v759_v36 }
 0x145   : > { %777 = vperm.xlu2 %1065, %v763_v13  }
 0x14a   : > { %v605_v15 = vpop.xlane.xlu1 %604 }
 0x14b   : > { %v611_v16 = vadd.f32 %v605_v15, %v595_v14 }
 0x14d   : > { %616 = vst.msk [vmem:[#allocation2 + $0x10] sm:$0xff] %vm390_vm1, %v611_v16 }
 0x14f   : > { %v740_v44 = vpop.xlane.xlu2 %739 }
 0x150   : > { %v748_v39 = vmax.f32 %v731_v17, %v740_v44 }
 0x152   : > { %752 = vst.msk [vmem:[#allocation3 + $0x8] sm:$0xff] %vm390_vm1, %v748_v39  ;;  %v608_v18 = vpop.xlane.xlu1 %607 }
 0x153   : > { %v612_v40 = vadd.f32 %v608_v18, %v596_v45  ;;  %v845_v45 = vld [vmem:[%s1516_s8] sm:$0x1] }
 0x154   : > { %v760_v19 = vld [vmem:[#allocation2 + $0x10] sm:$0xff] }
 0x155   : > { %617 = vst.msk [vmem:[#allocation2 + $0x18] sm:$0xff] %vm390_vm1, %v612_v40  ;;  %v764_v25 = vmul.f32 0.00390625, %v760_v19 }
 0x157   : > { %v743_v26 = vpop.xlane.xlu2 %742  ;;  %782 = vperm.xlu2 %1065, %v764_v25  }
 0x158   : > { %v749_v27 = vmax.f32 %v732_v21, %v743_v26  ;;  %v847_v26 = vlaneseq }
 0x159   : > { %v804_v54 = vld [vmem:[#allocation3 + $0x8] sm:$0xff] }
 0x15a   : > { %753 = vst.msk [vmem:[#allocation3 + $0x10] sm:$0xff] %vm390_vm1, %v749_v27  ;;  %818 = vperm.xlu1 %1064, %v804_v54   ;;  %v848_v54 = vand.u32 127, %v847_v26 }
 0x15c   : > { %v737_v55 = vpop.xlane.xlu0 %736  ;;  %v761_v31 = vld [vmem:[#allocation2 + $0x18] sm:$0xff]  ;;  %vm849_vm2 = vcmp.ge.s32.totalorder %v848_v54, 32  ;;  %vm850_vm3 = vcmp.lt.s32.totalorder %v848_v54, 64 }
 0x15d   : > { %v747_v24 = vmax.f32 %v730_v29, %v737_v55  ;;  %v765_v32 = vmul.f32 0.00390625, %v761_v31  ;;  %vm851_vm5 = vmand %vm849_vm2, %vm850_vm3 }
 0x15f   : > { %751 = vst.msk [vmem:[#allocation3] sm:$0xff] %vm390_vm1, %v747_v24  ;;  %787 = vperm.xlu2 %1065, %v765_v32  }
 0x161   : > { %v805_v30 = vld [vmem:[#allocation3 + $0x10] sm:$0xff] }
 0x162   : > { %823 = vperm.xlu1 %1064, %v805_v30  }
 0x166   : > { %v803_v33 = vld [vmem:[#allocation3] sm:$0xff] }
 0x167   : > { %813 = vperm.xlu0 %1063, %v803_v33  }
 0x16a   : > { %772 = vperm.xlu1 %1064, %v762_v37  }
 0x170   : > { %v746_v58 = vpop.xlane.xlu0 %745 }
 0x171   : > { %v750_v38 = vmax.f32 %v733_v43, %v746_v58 }
 0x173   : > { %754 = vst.msk [vmem:[#allocation3 + $0x18] sm:$0xff] %vm390_vm1, %v750_v38 }
 0x17a   : > { %v806_v34 = vld [vmem:[#allocation3 + $0x18] sm:$0xff] }
 0x17b   : > { %828 = vperm.xlu1 %1064, %v806_v34  }
 0x19f   : > { %v778_v42 = vpop.permute.xlu2 %777 }
 0x1a0   : > { %v791_v23 = vmul.f32 %v778_v42, %v767_v47 }
 0x1b1   : > { %v783_v56 = vpop.permute.xlu2 %782 }
 0x1b2   : > { %v792_v20 = vmul.f32 %v783_v56, %v768_v49 }
 0x1b9   : > { %v788_v59 = vpop.permute.xlu2 %787 }
 0x1ba   : > { %v793_v62 = vmul.f32 %v788_v59, %v769_v6 }
 0x1cc   : > { %v819_v41 = vpop.permute.xlu1 %818 }
 0x1cd   : > { %v832_v2 = vmul.f32 %v819_v41, %v808_v1 }
 0x1d4   : > { %v824_v46 = vpop.permute.xlu1 %823 }
 0x1d5   : > { %v833_v7 = vmul.f32 %v824_v46, %v809_v4 }
 0x1d9   : > { %v814_v63 = vpop.permute.xlu0 %813 }
 0x1da   : > { %v831_v51 = vmul.f32 %v814_v63, %v807_v53 }
 0x1dc   : > { %v773_v50 = vpop.permute.xlu1 %772  ;;  %v835_v28 = vadd.f32 %v832_v2, %v831_v51 }
 0x1dd   : > { %v790_v52 = vmul.f32 %v773_v50, %v766_v48 }
 0x1de   : > { %v836_v10 = vadd.f32 %v835_v28, %v833_v7 }
 0x1df   : > { %v794_v60 = vadd.f32 %v791_v23, %v790_v52 }
 0x1e1   : > { %v795_v61 = vadd.f32 %v794_v60, %v792_v20 }
 0x1e3   : > { %v796_v0 = vadd.f32 %v795_v61, %v793_v62 }
 0x1e5   : > { %v797_v3 = vrot.slane %v796_v0, 4 }
 0x1e7   : > { %v798_v8 = vadd.f32 %v797_v3, %v796_v0 }
 0x1e9   : > { %v799_v11 = vrot.slane %v798_v8, 2 }
 0x1eb   : > { %v800_v36 = vadd.f32 %v799_v11, %v798_v8 }
 0x1ed   : > { %v829_v9 = vpop.permute.xlu1 %828  ;;  %v801_v15 = vrot.slane %v800_v36, 1 }
 0x1ee   : > { %v834_v35 = vmul.f32 %v829_v9, %v810_v5 }
 0x1ef   : > { %v802_v44 = vadd.f32 %v801_v15, %v800_v36 }
 0x1f0   : > { %v837_v12 = vadd.f32 %v836_v10, %v834_v35 }
 0x1f2   : > { %v838_v22 = vrot.slane %v837_v12, 4 }
 0x1f4   : > { %v839_v13 = vadd.f32 %v838_v22, %v837_v12 }
 0x1f6   : > { %v840_v14 = vrot.slane %v839_v13, 2 }
 0x1f8   : > { %v841_v16 = vadd.f32 %v840_v14, %v839_v13 }
 0x1fa   : > { %v842_v17 = vrot.slane %v841_v16, 1 }
 0x1fc   : > { %v843_v39 = vadd.f32 %v842_v17, %v841_v16 }
 0x1fe   : > { %v844_v18 = vadd.f32 %v843_v39, %v802_v44 }
 0x200   : > { %v846_v40 = vadd.f32 %v845_v45, %v844_v18 }
 0x202   : > { %v978_v19 = vmul.f32 -1.442695, %v846_v40 }
 0x204   : > { %1066 = vpow2.f32 %v978_v19 }
 0x20a   : > { %v1067_v21 = vpop.eup %1066 }
 0x20b   : > { %v855_v25 = vadd.f32 1.0, %v1067_v21 }
 0x20d   : > { %1068 = vrcp.f32 %v855_v25  ;;  %v867_v31 = vand.u32 2147483648, %v855_v25  ;;  %v865_v32 = vand.u32 2147483647, %v855_v25  ;;  %vm861_vm6 = vweird.f32 %v855_v25 }
 0x20f   : > { %v868_v57 = vor.u32 1.1754944e-38, %v867_v31  ;;  %vm866_vm8 = vcmp.eq.f32.partialorder %v865_v32, 8.507059e+37 }
 0x213   : > { %v1069_v27 = vpop.eup %1068 }
 0x214   : > { %v857_v29 = vmul.f32 %v1069_v27, %v855_v25  ;;  %vm862_vm4 = vweird.f32 %v1069_v27 }
 0x215   : > { %vm863_vm7 = vmor %vm861_vm6, %vm862_vm4 }
 0x216   : > { %v858_v55 = vsub.f32 1.0, %v857_v29 }
 0x218   : > { %v859_v24 = vmul.f32 %v1069_v27, %v858_v55 }
 0x21a   : > { %v860_v30 = vadd.f32 %v1069_v27, %v859_v24 }
 0x21c   : > { %v864_v33 = vsel %vm863_vm7, %v1069_v27, %v860_v30 }
 0x21d   : > { %v869_v37 = vsel %vm866_vm8, %v868_v57, %v864_v33 }
 0x21e   : > { %v871_v43 = vsel %vm851_vm5, %v869_v37, %v846_v40 }
 0x21f   : > { %872 = vst [vmem:[%s368_s16] sm:$0x1] %v871_v43 }
 0x220   : > { %1097 = shalt.err (!%p1094_p5)
}
 0x221   : > { %982 = dma.vmem_to_hbm [thread:$0]  (%p1246_p4), %s885_s18, 16, %s887_s20, %s874_s12  }
 0x222 PF: > { %p988_p6 = scmp.ge.s32.totalorder %s1148_s14, 2  ;;  %s898_s27 = sand.u32 1, %s1128_s30  }
 0x223   : > { %s899_s16 = scalar_lea.sflag [#allocation5], %s898_s27 }
 0x224   : > { %p985_p7 = pnand %p988_p6, %p1253_p8 }
 0x226   : > { %p986_p9 = pneg %p985_p7 }
 0x228   : > { %1123 = dma.done.wait (%p986_p9), %s899_s16, 16  }
 0x229   : > { %1125 = vsyncadd (%p986_p9), %s899_s16, 4294967280  ;;  %s22_s14 = sadd.s32 1, %s1148_s14   ;;  %s1520_s30 = smov %s1132_s10 }
 0x22a   : > { %p19_p10 = scmp.ge.s32.totalorder %s22_s14, 4   ;;  %s1521_s10 = smov %s1136_s11 }
 0x22b   : > { %s1522_s11 = smov %s1259_s22  ;;  %s1523_s12 = smov %s1144_s13 }
 0x22c   : > { %s1524_s13 = smov %s1526_s17  ;;  %21 = sbr.rel (!%p19_p10) target bundleno = 4 (0x4), region = 102 }
 0x231   :  { %904 = vsyncpa [#allocation5], 1 }
 0x232   :  { %906 = vsyncpa [#allocation5 + $0x1], 1 }

</bundles_post_ra>
